<compile_context>
chip_gen: v7x
topology: tpu7x:2x2x1
jax: 0.10.0
libtpu: 0.0.40
codegen_flags: <defaults>
</compile_context>

<pallas_src>
import functools

import jax
import jax.numpy as jnp
from jax.experimental import pallas as pl
from jax.experimental.pallas import tpu as pltpu


def _round_up(n, m):
    return -(-n // m) * m


def _causal_conv1d_kernel(halo_ref, x_ref, w_ref, b_ref, o_ref, *, q_offsets, hb, tile_t):
    """One (batch row, time tile) step of the folded stride-1 causal conv.

    halo_ref: (1, Cp, Hb)            last Hb frames preceding this tile (zeros for t == 0)
    x_ref   : (1, Cp, tile_t)        folded channels-first input frames
    w_ref   : (C_out_pad, G*Cp)      all taps packed along the contraction (constant block)
    b_ref   : (C_out_pad, 1)         bias (f32, constant block)
    o_ref   : (1, C_out_pad, tile_t) NCL output block (time on lanes -> lane-dense store)
    """
    halo = halo_ref[0]                                    # (Cp, Hb)
    x_t = x_ref[0]                                        # (Cp, tile_t)

    # Hb is a multiple of 128 and tile_t is a multiple of 128 (or the full time extent),
    # so this concat is lane-aligned (each operand keeps its own vreg tiles).
    win = jnp.concatenate([halo, x_t], axis=1)            # (Cp, Hb + tile_t)

    # im2col along the contraction axis: group g = the window shifted back by q_g frames.
    rows = [x_t if q == 0 else win[:, hb - q:hb - q + tile_t] for q in q_offsets]
    lhs = rows[0] if len(rows) == 1 else jnp.concatenate(rows, axis=0)   # (G*Cp, tile_t)

    # Single MXU matmul; every kernel tap is accumulated inside the G*Cp contraction.
    y = jnp.dot(w_ref[...], lhs, preferred_element_type=jnp.float32)     # (C_out_pad, tile_t)
    y = y + b_ref[...]                                                   # lane broadcast

    # Result is already the NCL block (time on lanes): no transpose, lane-dense store.
    o_ref[...] = y[None].astype(o_ref.dtype)


def _default_vmem_budget_bytes():
    """Generation-aware scoped-VMEM budget (v7x: 64 MiB/TC; v4/v5e/v5p/v6e: 128 MiB)."""
    kind = ""
    try:
        kind = jax.devices()[0].device_kind.lower()
    except Exception:
        pass
    if "v2" in kind or "v3" in kind:
        return 8 * 1024 * 1024
    if any(tag in kind for tag in ("v4", "v5", "v6", "trillium")):
        return 96 * 1024 * 1024
    return 48 * 1024 * 1024            # unknown / v7x: stay well under 64 MiB physical VMEM


def _plan_time_tiling(T, tile_t, *, cp, g, c_out_pad, hb, in_bytes, out_bytes, budget):
    """Pick the largest time tile whose (double-buffered) VMEM footprint fits the budget."""
    def footprint(tile):
        return (2 * cp * tile * in_bytes                  # input block (double-buffered)
                + 2 * cp * hb * in_bytes                  # halo block
                + 2 * c_out_pad * tile * out_bytes        # output block
                + 2 * c_out_pad * g * cp * in_bytes       # folded weight (worst case 2 bufs)
                + cp * (hb + tile) * in_bytes             # in-kernel window value
                + g * cp * tile * in_bytes                # im2col LHS value
                + c_out_pad * tile * 4)                   # f32 matmul result

    if tile_t is not None:                                # explicit override (tests / tuning)
        if tile_t >= T:
            return T, 1
        assert tile_t % 128 == 0, "tile_t must be a multiple of 128 when tiling time"
        return tile_t, -(-T // tile_t)

    if T <= 128 or (T <= 1024 and footprint(T) <= budget):
        return T, 1
    tile = max(128, min(2048, (T // 128) * 128))
    while tile > 128 and footprint(tile) > budget:
        tile -= 128
    return tile, -(-T // tile)


def causal_conv1d(x, weight, bias, *, stride=1, dilation=1, pad_mode="constant",
                  compute_dtype=jnp.bfloat16, tile_t=None, vmem_budget_bytes=None):
    """Causal 1-D convolution matching DSTC CausalConv1d.forward (PyTorch NCL layout).

    Default contract: bf16 inputs to the MXU, f32 accumulation (set compute_dtype=jnp.float32
    or None for an all-f32 path).
    """
    if pad_mode != "constant":
        # TODO(synk): reflect/replicate causal padding is not implemented.
        raise NotImplementedError("only pad_mode='constant' is supported")

    B, C_in, L = x.shape
    C_out, C_in_w, K = weight.shape
    assert C_in_w == C_in, (C_in_w, C_in)
    s, d = int(stride), int(dilation)
    P = d * (K - 1) + (1 - s)                       # causal left padding of the torch module
    assert P >= 0, "stride > dilation*(kernel_size-1)+1 (negative padding) unsupported"
    L_out = (L + P - d * (K - 1) - 1) // s + 1
    assert L_out >= 1, "input too short for this kernel_size/stride/dilation"

    # ---- fold stride into channels: tap k reads frame (t - q) at phase r ----------------
    taps = []
    for k in range(K):
        c = (s - 1) - d * (K - 1 - k)               # sample offset relative to frame end
        taps.append((k, -(c // s), c % s))          # (tap, frames back q >= 0, phase r)
    q_offsets = tuple(sorted({q for _, q, _ in taps}))
    g_of_q = {q: g for g, q in enumerate(q_offsets)}
    G = len(q_offsets)
    H = q_offsets[-1]                               # receptive-field history in frames
    Cp = s * C_in
    Hb = _round_up(max(H, 1), 128)                  # lane-aligned halo width
    c_out_pad = _round_up(C_out, 8)                 # unmasked sublane stores

    cdt = x.dtype if compute_dtype is None else compute_dtype
    out_dtype = x.dtype
    in_bytes = jnp.dtype(cdt).itemsize
    out_bytes = jnp.dtype(out_dtype).itemsize

    # ---- generation-aware VMEM budget and time tiling ------------------------------------
    budget = int(vmem_budget_bytes or _default_vmem_budget_bytes())
    T = -(-L // s)                                  # number of input frames (ceil)
    tile_t, nt = _plan_time_tiling(T, tile_t, cp=Cp, g=G, c_out_pad=c_out_pad, hb=Hb,
                                   in_bytes=in_bytes, out_bytes=out_bytes, budget=budget)
    T_pad = nt * tile_t

    # ---- fold the input into frames, channels-first: (B, Cp, T_pad) ----------------------
    Lp = T_pad * s
    x_p = jnp.pad(x, ((0, 0), (0, 0), (0, Lp - L))) if Lp != L else x
    if s == 1:
        x_f = x_p                                   # no layout change at all for stride 1
    else:
        x_f = jnp.transpose(x_p.reshape(B, C_in, T_pad, s), (0, 3, 1, 2)).reshape(B, Cp, T_pad)
    x_f = x_f.astype(cdt)

    # ---- per-tile halo (replaces the cross-tile history carry) ---------------------------
    if nt == 1:
        halo = jnp.zeros((B, Cp, Hb), cdt)
    else:
        xp = jnp.pad(x_f, ((0, 0), (0, 0), (Hb, 0)))
        if Hb <= tile_t:
            halo = (xp[:, :, :nt * tile_t]
                    .reshape(B, Cp, nt, tile_t)[:, :, :, :Hb]
                    .reshape(B, Cp, nt * Hb))
        else:
            halo = jnp.concatenate(
                [xp[:, :, t * tile_t: t * tile_t + Hb] for t in range(nt)], axis=2)

    # ---- folded weight: all taps packed along the contraction (C_out_pad, G*Cp) ----------
    w2 = jnp.zeros((c_out_pad, G * Cp), dtype=weight.dtype)
    for k, q, r in taps:
        col = g_of_q[q] * Cp + r * C_in
        w2 = w2.at[:C_out, col:col + C_in].set(weight[:, :, k])
    w2 = w2.astype(cdt)
    b2 = jnp.zeros((c_out_pad, 1), jnp.float32).at[:C_out, 0].set(bias.astype(jnp.float32))

    kernel = functools.partial(_causal_conv1d_kernel,
                               q_offsets=q_offsets, hb=Hb, tile_t=tile_t)

    def _call(single_buffer_consts):
        const_kw = {}
        if single_buffer_consts and hasattr(pl, "Buffered"):
            const_kw = {"pipeline_mode": pl.Buffered(1)}   # constant blocks: no double-buffer
        return pl.pallas_call(
            kernel,
            out_shape=jax.ShapeDtypeStruct((B, c_out_pad, T_pad), out_dtype),
            grid=(B, nt),
            in_specs=[
                pl.BlockSpec((1, Cp, Hb), lambda b, t: (b, 0, t)),
                pl.BlockSpec((1, Cp, tile_t), lambda b, t: (b, 0, t)),
                pl.BlockSpec((c_out_pad, G * Cp), lambda b, t: (0, 0), **const_kw),
                pl.BlockSpec((c_out_pad, 1), lambda b, t: (0, 0), **const_kw),
            ],
            out_specs=pl.BlockSpec((1, c_out_pad, tile_t), lambda b, t: (b, 0, t)),
            compiler_params=pltpu.CompilerParams(
                dimension_semantics=("parallel", "parallel"),   # no carry -> time is parallel
                vmem_limit_bytes=budget,
            ),
        )(halo, x_f, w2, b2)

    try:
        out = _call(True)
    except Exception:  # jax version without pipeline_mode single-buffering: default buffering
        out = _call(False)

    # Crop the channel / time padding (NCL already; no transpose needed).
    return out[:, :C_out, :L_out]


def _reference(x, weight, bias, stride, dilation):
    """Pure-JAX reference: F.pad(left=P, mode='constant') followed by Conv1d."""
    B, C_in, L = x.shape
    C_out, _, K = weight.shape
    P = dilation * (K - 1) + (1 - stride)
    xp = jnp.pad(x.astype(jnp.float32), ((0, 0), (0, 0), (P, 0)))
    L_out = (L + P - dilation * (K - 1) - 1) // stride + 1
    out = jnp.zeros((B, C_out, L_out), jnp.float32) + bias.astype(jnp.float32)[None, :, None]
    for k in range(K):
        start = k * dilation
        sl = xp[:, :, start:start + (L_out - 1) * stride + 1:stride]   # (B, C_in, L_out)
        out = out + jnp.einsum("bil,oi->bol", sl, weight[:, :, k].astype(jnp.float32),
                               precision=jax.lax.Precision.HIGHEST)
    return out


def _run_case(name, *, B, C_in, C_out, K, L, stride, dilation, key,
              tile_t=None, compute_dtype=jnp.bfloat16, atol=5e-2, rtol=5e-2):
    kx, kw, kb = jax.random.split(key, 3)
    x = jax.random.normal(kx, (B, C_in, L), dtype=jnp.float32)
    w = jax.random.normal(kw, (C_out, C_in, K), dtype=jnp.float32) * 0.1
    b = jax.random.normal(kb, (C_out,), dtype=jnp.float32) * 0.1

    out = causal_conv1d(x, w, b, stride=stride, dilation=dilation,
                        tile_t=tile_t, compute_dtype=compute_dtype)
    out = jax.block_until_ready(out)

    ref = _reference(x, w, b, stride, dilation)
    assert out.shape == ref.shape, (name, out.shape, ref.shape)
    err = float(jnp.max(jnp.abs(out.astype(jnp.float32) - ref)))
    assert jnp.allclose(out.astype(jnp.float32), ref, atol=atol, rtol=rtol), (name, err)


if __name__ == "__main__":
    key = jax.random.PRNGKey(0)
    k1, k2, k3, k4, k5 = jax.random.split(key, 5)

    # Default module configuration (stride=1, dilation=1), bf16 compute path.
    _run_case("s1_d1", B=2, C_in=4, C_out=6, K=5, L=16, stride=1, dilation=1, key=k1)
    # Strided causal conv (stride folded into channels).
    _run_case("s2_d1", B=2, C_in=4, C_out=6, K=5, L=32, stride=2, dilation=1, key=k2)
    # Dilated conv, long enough to exercise the multi-tile grid + halo path.
    _run_case("s1_d2_tiled", B=2, C_in=4, C_out=6, K=5, L=256, stride=1, dilation=2,
              key=k3, tile_t=128)
    # f32 compute path with a tight tolerance (validates the fold/packing exactly).
    _run_case("s1_d1_f32", B=2, C_in=4, C_out=6, K=5, L=16, stride=1, dilation=1,
              key=k4, compute_dtype=jnp.float32, atol=5e-3, rtol=5e-3)
    # Wider channels, batch 1 (time-parallel grid), multi-tile, C_out multiple of 128.
    _run_case("wide_tiled", B=1, C_in=16, C_out=128, K=3, L=256, stride=1, dilation=1,
              key=k5, tile_t=128)

    print("KERNEL_OK")
</pallas_src>

<mosaic_0001>
module attributes {stable_mosaic.version = 11 : i64} {
  func.func @_causal_conv1d_kernel(%arg0: i32, %arg1: i32, %arg2: memref<1x4x128xbf16, #tpu.memory_space<vmem>>, %arg3: memref<1x4x16xbf16, #tpu.memory_space<vmem>>, %arg4: memref<8x20xbf16, #tpu.memory_space<vmem>>, %arg5: memref<8x1xf32, #tpu.memory_space<vmem>>, %arg6: memref<1x8x16xf32, #tpu.memory_space<vmem>>) attributes {dimension_semantics = [#tpu.dimension_semantics<parallel>, #tpu.dimension_semantics<parallel>], iteration_bounds = array<i64: 2, 1>, scalar_prefetch = 0 : i64, scratch_operands = 0 : i64, tpu.core_type = #tpu.core_type<tc>, window_params = [{transform_indices = @transform_0, window_bounds = array<i64: 1, 4, 128>}, {transform_indices = @transform_1, window_bounds = array<i64: 1, 4, 16>}, {pipeline_mode = #tpu.pipeline_mode<synchronous>, transform_indices = @transform_2, window_bounds = array<i64: 8, 20>}, {pipeline_mode = #tpu.pipeline_mode<synchronous>, transform_indices = @transform_3, window_bounds = array<i64: 8, 1>}, {transform_indices = @transform_4, window_bounds = array<i64: 1, 8, 16>}]} {
    %c0 = arith.constant 0 : index
    %c0_0 = arith.constant 0 : index
    %c0_1 = arith.constant 0 : index
    %0 = vector.load %arg2[%c0, %c0_0, %c0_1] : memref<1x4x128xbf16, #tpu.memory_space<vmem>>, vector<1x4x128xbf16>
    %1 = vector.shape_cast %0 : vector<1x4x128xbf16> to vector<4x128xbf16>
    %c0_2 = arith.constant 0 : index
    %c0_3 = arith.constant 0 : index
    %c0_4 = arith.constant 0 : index
    %2 = vector.load %arg3[%c0_2, %c0_3, %c0_4] : memref<1x4x16xbf16, #tpu.memory_space<vmem>>, vector<1x4x16xbf16>
    %3 = vector.shape_cast %2 : vector<1x4x16xbf16> to vector<4x16xbf16>
    %4 = tpu.concatenate %1, %3 in 1 : vector<4x128xbf16>, vector<4x16xbf16> -> vector<4x144xbf16>
    %5 = vector.extract_strided_slice %4 {offsets = [0, 127], sizes = [4, 16], strides = [1, 1]} : vector<4x144xbf16> to vector<4x16xbf16>
    %6 = vector.extract_strided_slice %4 {offsets = [0, 126], sizes = [4, 16], strides = [1, 1]} : vector<4x144xbf16> to vector<4x16xbf16>
    %7 = vector.extract_strided_slice %4 {offsets = [0, 125], sizes = [4, 16], strides = [1, 1]} : vector<4x144xbf16> to vector<4x16xbf16>
    %8 = vector.extract_strided_slice %4 {offsets = [0, 124], sizes = [4, 16], strides = [1, 1]} : vector<4x144xbf16> to vector<4x16xbf16>
    %9 = tpu.concatenate %3, %5, %6, %7, %8 in 0 : vector<4x16xbf16>, vector<4x16xbf16>, vector<4x16xbf16>, vector<4x16xbf16>, vector<4x16xbf16> -> vector<20x16xbf16>
    %c0_5 = arith.constant 0 : index
    %c0_6 = arith.constant 0 : index
    %10 = vector.load %arg4[%c0_5, %c0_6] : memref<8x20xbf16, #tpu.memory_space<vmem>>, vector<8x20xbf16>
    %cst = arith.constant dense<0.000000e+00> : vector<8x16xf32>
    %11 = tpu.matmul %10, %9, %cst {dimension_numbers = #tpu.dot_dimension_numbers<[1], [0], [0], [1], [0, 0, 1, 1], [], []>} : vector<8x20xbf16>, vector<20x16xbf16>, vector<8x16xf32> -> vector<8x16xf32>
    %c0_7 = arith.constant 0 : index
    %c0_8 = arith.constant 0 : index
    %12 = vector.load %arg5[%c0_7, %c0_8] : memref<8x1xf32, #tpu.memory_space<vmem>>, vector<8x1xf32>
    %13 = vector.broadcast %12 : vector<8x1xf32> to vector<8x16xf32>
    %14 = arith.addf %11, %13 : vector<8x16xf32>
    %15 = vector.shape_cast %14 : vector<8x16xf32> to vector<1x8x16xf32>
    %c0_9 = arith.constant 0 : index
    %c0_10 = arith.constant 0 : index
    %c0_11 = arith.constant 0 : index
    %16 = vector.load %arg6[%c0_9, %c0_10, %c0_11] : memref<1x8x16xf32, #tpu.memory_space<vmem>>, vector<1x8x16xf32>
    tpu.vector_store %arg6[%c0_9, %c0_10, %c0_11], %15 {strides = array<i32>} : memref<1x8x16xf32, #tpu.memory_space<vmem>>, vector<1x8x16xf32>,
    return
  }
  func.func @transform_0(%arg0: i32, %arg1: i32) -> (i32, i32, i32) {
    %c0_i32 = arith.constant 0 : i32
    %c0_i32_0 = arith.constant 0 : i32
    return %arg0, %c0_i32, %arg1 : i32, i32, i32
  }
  func.func @transform_1(%arg0: i32, %arg1: i32) -> (i32, i32, i32) {
    %c0_i32 = arith.constant 0 : i32
    %c0_i32_0 = arith.constant 0 : i32
    return %arg0, %c0_i32, %arg1 : i32, i32, i32
  }
  func.func @transform_2(%arg0: i32, %arg1: i32) -> (i32, i32) {
    %c0_i32 = arith.constant 0 : i32
    %c0_i32_0 = arith.constant 0 : i32
    %c0_i32_1 = arith.constant 0 : i32
    return %c0_i32, %c0_i32_0 : i32, i32
  }
  func.func @transform_3(%arg0: i32, %arg1: i32) -> (i32, i32) {
    %c0_i32 = arith.constant 0 : i32
    %c0_i32_0 = arith.constant 0 : i32
    %c0_i32_1 = arith.constant 0 : i32
    return %c0_i32, %c0_i32_0 : i32, i32
  }
  func.func @transform_4(%arg0: i32, %arg1: i32) -> (i32, i32, i32) {
    %c0_i32 = arith.constant 0 : i32
    %c0_i32_0 = arith.constant 0 : i32
    return %arg0, %c0_i32, %arg1 : i32, i32, i32
  }
}

module attributes {stable_mosaic.version = 11 : i64} {
  func.func @_causal_conv1d_kernel(%arg0: i32, %arg1: i32, %arg2: memref<1x4x128xbf16, #tpu.memory_space<vmem>>, %arg3: memref<1x4x16xbf16, #tpu.memory_space<vmem>>, %arg4: memref<8x20xbf16, #tpu.memory_space<vmem>>, %arg5: memref<8x1xf32, #tpu.memory_space<vmem>>, %arg6: memref<1x8x16xf32, #tpu.memory_space<vmem>>) attributes {dimension_semantics = [#tpu.dimension_semantics<parallel>, #tpu.dimension_semantics<parallel>], iteration_bounds = array<i64: 2, 1>, scalar_prefetch = 0 : i64, scratch_operands = 0 : i64, tpu.core_type = #tpu.core_type<tc>, window_params = [{transform_indices = @transform_0, window_bounds = array<i64: 1, 4, 128>}, {transform_indices = @transform_1, window_bounds = array<i64: 1, 4, 16>}, {pipeline_mode = #tpu.pipeline_mode<synchronous>, transform_indices = @transform_2, window_bounds = array<i64: 8, 20>}, {pipeline_mode = #tpu.pipeline_mode<synchronous>, transform_indices = @transform_3, window_bounds = array<i64: 8, 1>}, {transform_indices = @transform_4, window_bounds = array<i64: 1, 8, 16>}]} {
    %c0 = arith.constant 0 : index
    %c0_0 = arith.constant 0 : index
    %c0_1 = arith.constant 0 : index
    %0 = vector.load %arg2[%c0, %c0_0, %c0_1] : memref<1x4x128xbf16, #tpu.memory_space<vmem>>, vector<1x4x128xbf16>
    %1 = vector.shape_cast %0 : vector<1x4x128xbf16> to vector<4x128xbf16>
    %c0_2 = arith.constant 0 : index
    %c0_3 = arith.constant 0 : index
    %c0_4 = arith.constant 0 : index
    %2 = vector.load %arg3[%c0_2, %c0_3, %c0_4] : memref<1x4x16xbf16, #tpu.memory_space<vmem>>, vector<1x4x16xbf16>
    %3 = vector.shape_cast %2 : vector<1x4x16xbf16> to vector<4x16xbf16>
    %4 = tpu.concatenate %1, %3 in 1 : vector<4x128xbf16>, vector<4x16xbf16> -> vector<4x144xbf16>
    %5 = vector.extract_strided_slice %4 {offsets = [0, 127], sizes = [4, 16], strides = [1, 1]} : vector<4x144xbf16> to vector<4x16xbf16>
    %6 = vector.extract_strided_slice %4 {offsets = [0, 126], sizes = [4, 16], strides = [1, 1]} : vector<4x144xbf16> to vector<4x16xbf16>
    %7 = vector.extract_strided_slice %4 {offsets = [0, 125], sizes = [4, 16], strides = [1, 1]} : vector<4x144xbf16> to vector<4x16xbf16>
    %8 = vector.extract_strided_slice %4 {offsets = [0, 124], sizes = [4, 16], strides = [1, 1]} : vector<4x144xbf16> to vector<4x16xbf16>
    %9 = tpu.concatenate %3, %5, %6, %7, %8 in 0 : vector<4x16xbf16>, vector<4x16xbf16>, vector<4x16xbf16>, vector<4x16xbf16>, vector<4x16xbf16> -> vector<20x16xbf16>
    %c0_5 = arith.constant 0 : index
    %c0_6 = arith.constant 0 : index
    %10 = vector.load %arg4[%c0_5, %c0_6] : memref<8x20xbf16, #tpu.memory_space<vmem>>, vector<8x20xbf16>
    %cst = arith.constant dense<0.000000e+00> : vector<8x16xf32>
    %11 = tpu.matmul %10, %9, %cst {dimension_numbers = #tpu.dot_dimension_numbers<[1], [0], [0], [1], [0, 0, 1, 1], [], []>} : vector<8x20xbf16>, vector<20x16xbf16>, vector<8x16xf32> -> vector<8x16xf32>
    %c0_7 = arith.constant 0 : index
    %c0_8 = arith.constant 0 : index
    %12 = vector.load %arg5[%c0_7, %c0_8] : memref<8x1xf32, #tpu.memory_space<vmem>>, vector<8x1xf32>
    %13 = vector.broadcast %12 : vector<8x1xf32> to vector<8x16xf32>
    %14 = arith.addf %11, %13 : vector<8x16xf32>
    %15 = vector.shape_cast %14 : vector<8x16xf32> to vector<1x8x16xf32>
    %c0_9 = arith.constant 0 : index
    %c0_10 = arith.constant 0 : index
    %c0_11 = arith.constant 0 : index
    %16 = vector.load %arg6[%c0_9, %c0_10, %c0_11] : memref<1x8x16xf32, #tpu.memory_space<vmem>>, vector<1x8x16xf32>
    tpu.vector_store %arg6[%c0_9, %c0_10, %c0_11], %15 {strides = array<i32>} : memref<1x8x16xf32, #tpu.memory_space<vmem>>, vector<1x8x16xf32>,
    return
  }
  func.func @transform_0(%arg0: i32, %arg1: i32) -> (i32, i32, i32) {
    %c0_i32 = arith.constant 0 : i32
    %c0_i32_0 = arith.constant 0 : i32
    return %arg0, %c0_i32, %arg1 : i32, i32, i32
  }
  func.func @transform_1(%arg0: i32, %arg1: i32) -> (i32, i32, i32) {
    %c0_i32 = arith.constant 0 : i32
    %c0_i32_0 = arith.constant 0 : i32
    return %arg0, %c0_i32, %arg1 : i32, i32, i32
  }
  func.func @transform_2(%arg0: i32, %arg1: i32) -> (i32, i32) {
    %c0_i32 = arith.constant 0 : i32
    %c0_i32_0 = arith.constant 0 : i32
    %c0_i32_1 = arith.constant 0 : i32
    return %c0_i32, %c0_i32_0 : i32, i32
  }
  func.func @transform_3(%arg0: i32, %arg1: i32) -> (i32, i32) {
    %c0_i32 = arith.constant 0 : i32
    %c0_i32_0 = arith.constant 0 : i32
    %c0_i32_1 = arith.constant 0 : i32
    return %c0_i32, %c0_i32_0 : i32, i32
  }
  func.func @transform_4(%arg0: i32, %arg1: i32) -> (i32, i32, i32) {
    %c0_i32 = arith.constant 0 : i32
    %c0_i32_0 = arith.constant 0 : i32
    return %arg0, %c0_i32, %arg1 : i32, i32, i32
  }
}

</mosaic_0001>

<bundles_post_ra>
// kernel: tpu_custom_call.1
= control target key start
LH: loop header
LB: loop body
LE: loop exit
PB: predicated region body
PF: predicated region fallthrough
CT: control target
= control target key end

     0   :  { %9 = vsyncpa [#allocation3], 0  ;;  %s772_s0 = inlined_call_operand.vmem [shape: bf16[2,4,128], index: 0, kind: input, shape index: {}]   ;;  %s773_s1 = inlined_call_operand.vmem [shape: bf16[2,4,16], index: 1, kind: input, shape index: {}]   ;;  %s774_s2 = inlined_call_operand.vmem [shape: bf16[8,20], index: 2, kind: input, shape index: {}]   ;;  %s775_s3 = inlined_call_operand.vmem [shape: f32[8,1], index: 3, kind: input, shape index: {}]   ;;  %s776_s4 = inlined_call_operand.hbm [shape: f32[2,8,16], index: 4, kind: output, shape index: {}]  }
   0x1   :  { %11 = vsyncpa [#allocation3 + $0x1], 0  ;;  %s649_s15 = smov 0   ;;  %s651_s16 = smov 0  }
   0x2   :  { %s653_s17 = smov 0   ;;  %s655_s18 = smov 0  }
   0x3   :  { %s657_s19 = smov 0   ;;  %s659_s20 = smov 0  }
   0x4 LB: > { %s449_s21 = sadd.s32 4294967295, %s614_s20   ;;  %s450_s22 = sadd.s32 4294967294, %s614_s20   ;;  %s614_s20 = sphi %s659_s20, %s17_s20   ;;  %s610_s19 = sphi %s657_s19, %s783_s19   ;;  %s606_s18 = sphi %s655_s18, %s782_s18   ;;  %s602_s17 = sphi %s653_s17, %s781_s17   ;;  %s598_s16 = sphi %s651_s16, %s780_s16   ;;  %s594_s15 = sphi %s649_s15, %s779_s15  }
   0x5   : > { %s29_s23 = sadd.s32 1, %s610_s19  ;;  %s136_s24 = sadd.s32 1, %s602_s17 }
   0x6   : > { %p31_p0 = scmp.ge.s32.totalorder %s29_s23, 2  ;;  %p146_p1 = scmp.ne.s32.totalorder %s602_s17, %s598_s16 }
   0x7   : > { %p147_p2 = scmp.eq.s32.totalorder %s449_s21, 1  ;;  %p152_p3 = scmp.ne.s32.totalorder %s598_s16, %s594_s15 }
   0x8   : > { %s785_s23 = smov (%p31_p0, %s29_s23), 0  ;;  %p153_p5 = scmp.eq.s32.totalorder %s450_s22, 1 }
   0x9   : > { %p689_p4 = por %p147_p2, %p146_p1  ;;  %s131_s26 = ssub.s32 %s610_s19, %s785_s23 }
   0xa   : > { %p453_p6 = scmp.ge.s32.totalorder %s614_s20, 1  ;;  %p134_p7 = scmp.eq.s32.totalorder %s131_s26, 0 }
   0xb   : > { %p696_p8 = por %p153_p5, %p152_p3  ;;  %p197_p9 = scmp.lt.s32.totalorder %s614_s20, 3 }
   0xc   : > { %s702_s28 = scalar_select %p134_p7, %s602_s17, %s136_s24  }
   0xd   : > { %p198_p10 = pnand %p453_p6, %p197_p9 }
   0xe   : > { %p232_p11 = scmp.lt.s32.totalorder (!%p198_p10), %s606_s18, 1  ;;  %v616_v0 = vmov (!%p198_p10), 0.0   ;;  %s617_s11 = smov (!%p198_p10), 2   ;;  %vm619_vm0 = vmmov (!%p198_p10), 0   ;;  %v620_v9 = vmov (!%p198_p10), 0   ;;  %v293_v10 = vld [vmem:[%s775_s3] sm:$0xff] (!%p198_p10) }
   0xf   : > { %201 = sbr.rel (%p198_p10) target bundleno = 389 (0x185), region = 36  ;;  %465 = vmatprep.subr.bf16.mxu0 (!%p198_p10), %v616_v0  ;;  %s618_s12 = smov (!%p198_p10), 1   ;;  %469 = vmatprep.mubr.msk.bf16.mxu0 (!%p198_p10), %vm619_vm0, %v616_v0  ;;  %vm257_vm1 = vcmask (!%p198_p10), 7168   ;;  %vm265_vm2 = vcmask (!%p198_p10), 15360   ;;  %vm281_vm3 = vcmask (!%p198_p10), 1041408   ;;  %vm273_vm4 = vcmask (!%p198_p10), 23552  }
  0x10   : > { %535 = vset.pattern.permute.xlu0 (!%p198_p10), %v620_v9  ;;  %s621_s13 = smov (!%p198_p10), 3   ;;  %s622_s14 = smov (!%p198_p10), 4   ;;  %vm285_vm5 = vcmask (!%p198_p10), 1043456   ;;  %vm288_vm6 = vcmask (!%p198_p10), 1045504   ;;  %vm279_vm7 = vcmask (!%p198_p10), 31744   ;;  %vm299_vm8 = vcmask (!%p198_p10), 162816  }
  0x11   : > { %v292_v27 = vld [vmem:[%s774_s2] sm:$0xf] (!%p198_p10)  ;;  %s459_s5 = sshll.u32 (!%p198_p10), %s606_s18, 7  ;;  %vm346_vm9 = vcmask (!%p198_p10), 130048  }
  0x16   : > { %s233_s29 = scalar_select %p232_p11, %s606_s18, 1 }
  0x18   : > { %s455_s30 = sshll.u32 %s233_s29, 1  ;;  %s229_s29 = sand.u32 1, %s598_s16  }
  0x19   : > { %s238_s7 = scalar_lea.vmem %s772_s0, %s455_s30  ;;  %s245_s10 = scalar_lea.vmem %s773_s1, %s455_s30 }
  0x1a   : > { %v247_v1 = vld [vmem:[%s238_s7] sm:$0x3]  ;;  %s454_s30 = sshll.u32 %s229_s29, 3  ;;  %s349_s18 = scalar_lea.sflag [#allocation3], %s229_s29 }
  0x1b   : > { %v248_v2 = vld [vmem:[%s245_s10] sm:$0x3]  ;;  %v259_v3 = vrot.slane %v247_v1, 4  ;;  %v251_v4 = vrot.slane %v247_v1, 6  ;;  %v267_v8 = vrot.slane %v247_v1, 2  ;;  %s231_s6 = scalar_lea.vmem [#allocation2], %s454_s30  ;;  %s725_s10 = scalar_lea.hbm %s776_s4, %s459_s5 }
  0x1c   : > { %v260_v5 = vrot.slane %v248_v2, 4  ;;  %v252_v6 = vrot.slane %v248_v2, 6  ;;  %v268_v7 = vrot.slane %v248_v2, 2  ;;  %s363_s7 = sshll.u32 %s231_s6, 4  ;;  %s727_s7 = int_to_ptr.vmem [resolvable:$true] %s363_s7 }
  0x1d   : > { %261 = vrot.lane.b32.xlu1 %v259_v3, %s617_s11  ;;  %253 = vrot.lane.b32.xlu0 %v251_v4, %s618_s12 }
  0x21   : > { %263 = vrot.lane.b32.xlu1 %v260_v5, %s617_s11  ;;  %255 = vrot.lane.b32.xlu0 %v252_v6, %s618_s12  ;;  %s536_s11 = scalar_lea.vmem %s727_s7, 128  ;;  %s623_s12 = smov [#allocation2]  }
  0x22   : > { %p537_p12 = scmp.ne.s32.totalorder %s727_s7, %s536_s11 }
  0x24   : > { %p538_p13 = pnand %p537_p12, %p689_p4 }
  0x25   : > { %271 = vrot.lane.b32.xlu1 %v268_v7, %s621_s13  ;;  %269 = vrot.lane.b32.xlu0 %v267_v8, %s621_s13  ;;  %s540_s13 = sshll.u32 %s623_s12, 4  ;;  %s541_s13 = int_to_ptr.vmem [resolvable:$false] %s540_s13 }
  0x26   : > { %p539_p0 = pneg %p538_p13  ;;  %p543_p1 = scmp.lt.s32.totalorder %s727_s7, %s541_s13 }
  0x29   : > { %277 = vrot.lane.b32.xlu1 %v248_v2, %s622_s14  ;;  %275 = vrot.lane.b32.xlu0 %v247_v1, %s622_s14  ;;  %s542_s14 = scalar_lea.vmem %s541_s13, 256 }
  0x2a   : > { %p544_p2 = scmp.lt.s32.totalorder %s542_s14, %s536_s11 }
  0x2c   : > { %p545_p3 = por %p544_p2, %p543_p1 }
  0x2d   : > { %296 = vperm.xlu0 %535, %v293_v10  }
  0x2e   : > { %p546_p5 = pnand %p545_p3, %p539_p0 }
  0x8f   : > { %v262_v11 = vpop.permute.xlu1 %261  ;;  %v254_v12 = vpop.permute.xlu0 %253 }
  0x93   : > { %v264_v13 = vpop.permute.xlu1 %263  ;;  %v256_v14 = vpop.permute.xlu0 %255 }
  0x94   : > { %v258_v15 = vsel %vm257_vm1, %v254_v12, %v256_v14  ;;  %v266_v16 = vsel %vm265_vm2, %v262_v11, %v264_v13 }
  0x95   : > { %v284_v17 = vsel %vm281_vm3, %v248_v2, %v258_v15 }
  0x96   : > { %v287_v21 = vsel %vm285_vm5, %v284_v17, %v266_v16 }
  0x97   : > { %v272_v18 = vpop.permute.xlu1 %271  ;;  %v270_v19 = vpop.permute.xlu0 %269 }
  0x98   : > { %v274_v20 = vsel %vm273_vm4, %v270_v19, %v272_v18 }
  0x99   : > { %v290_v22 = vsel %vm288_vm6, %v287_v21, %v274_v20 }
  0x9a   : > { %466 = vmatpush3.bf16.msra.mxu0 %v290_v22 }
  0x9b   : > { %v278_v23 = vpop.permute.xlu1 %277  ;;  %v276_v24 = vpop.permute.xlu0 %275  ;;  %467 = vmatprep.subr.bf16.mxu0 %v616_v0 }
  0x9c   : > { %v280_v25 = vsel %vm279_vm7, %v276_v24, %v278_v23 }
  0x9d   : > { %v304_v26 = vsel %vm281_vm3, %v280_v25, 0 }
  0x9e   : > { %468 = vmatpush3.bf16.msra.mxu0 %v304_v26 }
  0xa1   : > { %470 = vmatmul.mubr.msk.bf16.vlgmr.msra.gmra.mrb[0].mxu0 %vm299_vm8, %v292_v27 }
  0xac   : > { %v297_v28 = vpop.permute.xlu0 %296 }
 0x174   : > { %v340_v29 = vpop.f32.mrb[0].mxu0 }
 0x175   : > { %v341_v30 = vadd.f32 %v340_v29, %v297_v28  ;;  %v471_v31 = vpop.f32.mrb[1].mxu0 }
 0x176   : > { %v343_v32 = vpop.f32.mrb[2].mxu0 }
 0x177   : > { %v472_v33 = vpop.f32.mrb[3].mxu0  ;;  %347 = vst.msk [vmem:[%s231_s6] sm:$0xff] %vm346_vm9, %v341_v30 }
 0x178   : > { %549 = shalt.err (!%p546_p5)
}
 0x179   : > { %s550_s21 = scalar_lea.hbm %s725_s10, 128  ;;  %s554_s26 = scalar_lea.hbm %s776_s4, 256 }
 0x17a   : > { %p551_p6 = scmp.ne.s32.totalorder %s725_s10, %s550_s21  ;;  %p555_p10 = scmp.lt.u32.totalorder %s725_s10, %s776_s4 }
 0x17b   : > { %p556_p11 = scmp.lt.u32.totalorder %s554_s26, %s550_s21  ;;  %p558_p13 = scmp.lt.u32.totalorder %s550_s21, %s725_s10 }
 0x17c   : > { %p552_p7 = pnand %p551_p6, %p689_p4 }
 0x17d   : > { %p557_p12 = por %p556_p11, %p555_p10 }
 0x17e   : > { %p553_p9 = pneg %p552_p7 }
 0x17f   : > { %p559_p0 = por %p558_p13, %p557_p12 }
 0x181   : > { %p560_p1 = pnand %p559_p0, %p553_p9 }
 0x183   : > { %563 = shalt.err (!%p560_p1)
}
 0x184   : > { %473 = dma.vmem_to_hbm [thread:$0]  (%p689_p4), %s727_s7, 128, %s725_s10, %s349_s18  }
 0x185 PF: > { %p479_p2 = scmp.ge.s32.totalorder %s614_s20, 2  ;;  %s375_s5 = sand.u32 1, %s594_s15  }
 0x186   : > { %s376_s6 = scalar_lea.sflag [#allocation3], %s375_s5 }
 0x187   : > { %p476_p3 = pnand %p479_p2, %p696_p8 }
 0x189   : > { %589 = dma.done.wait (!%p476_p3), %s376_s6, 128  }
 0x18a   : > { %591 = vsyncadd (!%p476_p3), %s376_s6, 4294967168  ;;  %s17_s20 = sadd.s32 1, %s614_s20   ;;  %s779_s15 = smov %s598_s16 }
 0x18b   : > { %p14_p5 = scmp.ge.s32.totalorder %s17_s20, 4   ;;  %s780_s16 = smov %s602_s17 }
 0x18c   : > { %s781_s17 = smov %s702_s28  ;;  %s782_s18 = smov %s610_s19 }
 0x18d   : > { %s783_s19 = smov %s785_s23  ;;  %16 = sbr.rel (!%p14_p5) target bundleno = 4 (0x4), region = 74 }
 0x194   :  { %381 = vsyncpa [#allocation3], 1 }
 0x195   :  { %383 = vsyncpa [#allocation3 + $0x1], 1 }

// kernel: tpu_custom_call.1
= control target key start
LH: loop header
LB: loop body
LE: loop exit
PB: predicated region body
PF: predicated region fallthrough
CT: control target
= control target key end

     0   :  { %9 = vsyncpa [#allocation3], 0  ;;  %s772_s0 = inlined_call_operand.vmem [shape: bf16[2,4,128], index: 0, kind: input, shape index: {}]   ;;  %s773_s1 = inlined_call_operand.vmem [shape: bf16[2,4,16], index: 1, kind: input, shape index: {}]   ;;  %s774_s2 = inlined_call_operand.vmem [shape: bf16[8,20], index: 2, kind: input, shape index: {}]   ;;  %s775_s3 = inlined_call_operand.vmem [shape: f32[8,1], index: 3, kind: input, shape index: {}]   ;;  %s776_s4 = inlined_call_operand.hbm [shape: f32[2,8,16], index: 4, kind: output, shape index: {}]  }
   0x1   :  { %11 = vsyncpa [#allocation3 + $0x1], 0  ;;  %s649_s15 = smov 0   ;;  %s651_s16 = smov 0  }
   0x2   :  { %s653_s17 = smov 0   ;;  %s655_s18 = smov 0  }
   0x3   :  { %s657_s19 = smov 0   ;;  %s659_s20 = smov 0  }
   0x4 LB: > { %s449_s21 = sadd.s32 4294967295, %s614_s20   ;;  %s450_s22 = sadd.s32 4294967294, %s614_s20   ;;  %s614_s20 = sphi %s659_s20, %s17_s20   ;;  %s610_s19 = sphi %s657_s19, %s783_s19   ;;  %s606_s18 = sphi %s655_s18, %s782_s18   ;;  %s602_s17 = sphi %s653_s17, %s781_s17   ;;  %s598_s16 = sphi %s651_s16, %s780_s16   ;;  %s594_s15 = sphi %s649_s15, %s779_s15  }
   0x5   : > { %s29_s23 = sadd.s32 1, %s610_s19  ;;  %s136_s24 = sadd.s32 1, %s602_s17 }
   0x6   : > { %p31_p0 = scmp.ge.s32.totalorder %s29_s23, 2  ;;  %p146_p1 = scmp.ne.s32.totalorder %s602_s17, %s598_s16 }
   0x7   : > { %p147_p2 = scmp.eq.s32.totalorder %s449_s21, 1  ;;  %p152_p3 = scmp.ne.s32.totalorder %s598_s16, %s594_s15 }
   0x8   : > { %s785_s23 = smov (%p31_p0, %s29_s23), 0  ;;  %p153_p5 = scmp.eq.s32.totalorder %s450_s22, 1 }
   0x9   : > { %p689_p4 = por %p147_p2, %p146_p1  ;;  %s131_s26 = ssub.s32 %s610_s19, %s785_s23 }
   0xa   : > { %p453_p6 = scmp.ge.s32.totalorder %s614_s20, 1  ;;  %p134_p7 = scmp.eq.s32.totalorder %s131_s26, 0 }
   0xb   : > { %p696_p8 = por %p153_p5, %p152_p3  ;;  %p197_p9 = scmp.lt.s32.totalorder %s614_s20, 3 }
   0xc   : > { %s702_s28 = scalar_select %p134_p7, %s602_s17, %s136_s24  }
   0xd   : > { %p198_p10 = pnand %p453_p6, %p197_p9 }
   0xe   : > { %p232_p11 = scmp.lt.s32.totalorder (!%p198_p10), %s606_s18, 1  ;;  %v616_v0 = vmov (!%p198_p10), 0.0   ;;  %s617_s11 = smov (!%p198_p10), 2   ;;  %vm619_vm0 = vmmov (!%p198_p10), 0   ;;  %v620_v9 = vmov (!%p198_p10), 0   ;;  %v293_v10 = vld [vmem:[%s775_s3] sm:$0xff] (!%p198_p10) }
   0xf   : > { %201 = sbr.rel (%p198_p10) target bundleno = 389 (0x185), region = 36  ;;  %465 = vmatprep.subr.bf16.mxu0 (!%p198_p10), %v616_v0  ;;  %s618_s12 = smov (!%p198_p10), 1   ;;  %469 = vmatprep.mubr.msk.bf16.mxu0 (!%p198_p10), %vm619_vm0, %v616_v0  ;;  %vm257_vm1 = vcmask (!%p198_p10), 7168   ;;  %vm265_vm2 = vcmask (!%p198_p10), 15360   ;;  %vm281_vm3 = vcmask (!%p198_p10), 1041408   ;;  %vm273_vm4 = vcmask (!%p198_p10), 23552  }
  0x10   : > { %535 = vset.pattern.permute.xlu0 (!%p198_p10), %v620_v9  ;;  %s621_s13 = smov (!%p198_p10), 3   ;;  %s622_s14 = smov (!%p198_p10), 4   ;;  %vm285_vm5 = vcmask (!%p198_p10), 1043456   ;;  %vm288_vm6 = vcmask (!%p198_p10), 1045504   ;;  %vm279_vm7 = vcmask (!%p198_p10), 31744   ;;  %vm299_vm8 = vcmask (!%p198_p10), 162816  }
  0x11   : > { %v292_v27 = vld [vmem:[%s774_s2] sm:$0xf] (!%p198_p10)  ;;  %s459_s5 = sshll.u32 (!%p198_p10), %s606_s18, 7  ;;  %vm346_vm9 = vcmask (!%p198_p10), 130048  }
  0x16   : > { %s233_s29 = scalar_select %p232_p11, %s606_s18, 1 }
  0x18   : > { %s455_s30 = sshll.u32 %s233_s29, 1  ;;  %s229_s29 = sand.u32 1, %s598_s16  }
  0x19   : > { %s238_s7 = scalar_lea.vmem %s772_s0, %s455_s30  ;;  %s245_s10 = scalar_lea.vmem %s773_s1, %s455_s30 }
  0x1a   : > { %v247_v1 = vld [vmem:[%s238_s7] sm:$0x3]  ;;  %s454_s30 = sshll.u32 %s229_s29, 3  ;;  %s349_s18 = scalar_lea.sflag [#allocation3], %s229_s29 }
  0x1b   : > { %v248_v2 = vld [vmem:[%s245_s10] sm:$0x3]  ;;  %v259_v3 = vrot.slane %v247_v1, 4  ;;  %v251_v4 = vrot.slane %v247_v1, 6  ;;  %v267_v8 = vrot.slane %v247_v1, 2  ;;  %s231_s6 = scalar_lea.vmem [#allocation2], %s454_s30  ;;  %s725_s10 = scalar_lea.hbm %s776_s4, %s459_s5 }
  0x1c   : > { %v260_v5 = vrot.slane %v248_v2, 4  ;;  %v252_v6 = vrot.slane %v248_v2, 6  ;;  %v268_v7 = vrot.slane %v248_v2, 2  ;;  %s363_s7 = sshll.u32 %s231_s6, 4  ;;  %s727_s7 = int_to_ptr.vmem [resolvable:$true] %s363_s7 }
  0x1d   : > { %261 = vrot.lane.b32.xlu1 %v259_v3, %s617_s11  ;;  %253 = vrot.lane.b32.xlu0 %v251_v4, %s618_s12 }
  0x21   : > { %263 = vrot.lane.b32.xlu1 %v260_v5, %s617_s11  ;;  %255 = vrot.lane.b32.xlu0 %v252_v6, %s618_s12  ;;  %s536_s11 = scalar_lea.vmem %s727_s7, 128  ;;  %s623_s12 = smov [#allocation2]  }
  0x22   : > { %p537_p12 = scmp.ne.s32.totalorder %s727_s7, %s536_s11 }
  0x24   : > { %p538_p13 = pnand %p537_p12, %p689_p4 }
  0x25   : > { %271 = vrot.lane.b32.xlu1 %v268_v7, %s621_s13  ;;  %269 = vrot.lane.b32.xlu0 %v267_v8, %s621_s13  ;;  %s540_s13 = sshll.u32 %s623_s12, 4  ;;  %s541_s13 = int_to_ptr.vmem [resolvable:$false] %s540_s13 }
  0x26   : > { %p539_p0 = pneg %p538_p13  ;;  %p543_p1 = scmp.lt.s32.totalorder %s727_s7, %s541_s13 }
  0x29   : > { %277 = vrot.lane.b32.xlu1 %v248_v2, %s622_s14  ;;  %275 = vrot.lane.b32.xlu0 %v247_v1, %s622_s14  ;;  %s542_s14 = scalar_lea.vmem %s541_s13, 256 }
  0x2a   : > { %p544_p2 = scmp.lt.s32.totalorder %s542_s14, %s536_s11 }
  0x2c   : > { %p545_p3 = por %p544_p2, %p543_p1 }
  0x2d   : > { %296 = vperm.xlu0 %535, %v293_v10  }
  0x2e   : > { %p546_p5 = pnand %p545_p3, %p539_p0 }
  0x8f   : > { %v262_v11 = vpop.permute.xlu1 %261  ;;  %v254_v12 = vpop.permute.xlu0 %253 }
  0x93   : > { %v264_v13 = vpop.permute.xlu1 %263  ;;  %v256_v14 = vpop.permute.xlu0 %255 }
  0x94   : > { %v258_v15 = vsel %vm257_vm1, %v254_v12, %v256_v14  ;;  %v266_v16 = vsel %vm265_vm2, %v262_v11, %v264_v13 }
  0x95   : > { %v284_v17 = vsel %vm281_vm3, %v248_v2, %v258_v15 }
  0x96   : > { %v287_v21 = vsel %vm285_vm5, %v284_v17, %v266_v16 }
  0x97   : > { %v272_v18 = vpop.permute.xlu1 %271  ;;  %v270_v19 = vpop.permute.xlu0 %269 }
  0x98   : > { %v274_v20 = vsel %vm273_vm4, %v270_v19, %v272_v18 }
  0x99   : > { %v290_v22 = vsel %vm288_vm6, %v287_v21, %v274_v20 }
  0x9a   : > { %466 = vmatpush3.bf16.msra.mxu0 %v290_v22 }
  0x9b   : > { %v278_v23 = vpop.permute.xlu1 %277  ;;  %v276_v24 = vpop.permute.xlu0 %275  ;;  %467 = vmatprep.subr.bf16.mxu0 %v616_v0 }
  0x9c   : > { %v280_v25 = vsel %vm279_vm7, %v276_v24, %v278_v23 }
  0x9d   : > { %v304_v26 = vsel %vm281_vm3, %v280_v25, 0 }
  0x9e   : > { %468 = vmatpush3.bf16.msra.mxu0 %v304_v26 }
  0xa1   : > { %470 = vmatmul.mubr.msk.bf16.vlgmr.msra.gmra.mrb[0].mxu0 %vm299_vm8, %v292_v27 }
  0xac   : > { %v297_v28 = vpop.permute.xlu0 %296 }
 0x174   : > { %v340_v29 = vpop.f32.mrb[0].mxu0 }
 0x175   : > { %v341_v30 = vadd.f32 %v340_v29, %v297_v28  ;;  %v471_v31 = vpop.f32.mrb[1].mxu0 }
 0x176   : > { %v343_v32 = vpop.f32.mrb[2].mxu0 }
 0x177   : > { %v472_v33 = vpop.f32.mrb[3].mxu0  ;;  %347 = vst.msk [vmem:[%s231_s6] sm:$0xff] %vm346_vm9, %v341_v30 }
 0x178   : > { %549 = shalt.err (!%p546_p5)
}
 0x179   : > { %s550_s21 = scalar_lea.hbm %s725_s10, 128  ;;  %s554_s26 = scalar_lea.hbm %s776_s4, 256 }
 0x17a   : > { %p551_p6 = scmp.ne.s32.totalorder %s725_s10, %s550_s21  ;;  %p555_p10 = scmp.lt.u32.totalorder %s725_s10, %s776_s4 }
 0x17b   : > { %p556_p11 = scmp.lt.u32.totalorder %s554_s26, %s550_s21  ;;  %p558_p13 = scmp.lt.u32.totalorder %s550_s21, %s725_s10 }
 0x17c   : > { %p552_p7 = pnand %p551_p6, %p689_p4 }
 0x17d   : > { %p557_p12 = por %p556_p11, %p555_p10 }
 0x17e   : > { %p553_p9 = pneg %p552_p7 }
 0x17f   : > { %p559_p0 = por %p558_p13, %p557_p12 }
 0x181   : > { %p560_p1 = pnand %p559_p0, %p553_p9 }
 0x183   : > { %563 = shalt.err (!%p560_p1)
}
 0x184   : > { %473 = dma.vmem_to_hbm [thread:$0]  (%p689_p4), %s727_s7, 128, %s725_s10, %s349_s18  }
 0x185 PF: > { %p479_p2 = scmp.ge.s32.totalorder %s614_s20, 2  ;;  %s375_s5 = sand.u32 1, %s594_s15  }
 0x186   : > { %s376_s6 = scalar_lea.sflag [#allocation3], %s375_s5 }
 0x187   : > { %p476_p3 = pnand %p479_p2, %p696_p8 }
 0x189   : > { %589 = dma.done.wait (!%p476_p3), %s376_s6, 128  }
 0x18a   : > { %591 = vsyncadd (!%p476_p3), %s376_s6, 4294967168  ;;  %s17_s20 = sadd.s32 1, %s614_s20   ;;  %s779_s15 = smov %s598_s16 }
 0x18b   : > { %p14_p5 = scmp.ge.s32.totalorder %s17_s20, 4   ;;  %s780_s16 = smov %s602_s17 }
 0x18c   : > { %s781_s17 = smov %s702_s28  ;;  %s782_s18 = smov %s610_s19 }
 0x18d   : > { %s783_s19 = smov %s785_s23  ;;  %16 = sbr.rel (!%p14_p5) target bundleno = 4 (0x4), region = 74 }
 0x194   :  { %381 = vsyncpa [#allocation3], 1 }
 0x195   :  { %383 = vsyncpa [#allocation3 + $0x1], 1 }

</bundles_post_ra>
